<compile_context>
chip_gen: v6e
topology: v6e:2x2x1
jax: 0.10.0
libtpu: 0.0.40
codegen_flags: <defaults>
</compile_context>

<pallas_src>
import math
from functools import partial

import numpy as np
import jax
import jax.numpy as jnp
from jax.experimental import pallas as pl
from jax.experimental.pallas import tpu as pltpu


def pe_add_kernel(pos_ref, w_ref, phase_ref, x_ref, o_ref):
    """o = x + sin(pos @ W + phase).

    pos_ref   : (tm, k)    f32  position of each of the k rows packed per row
    w_ref     : (k, k*D)   f32  W[r, r*D + d] = inv_freq[d], zero elsewhere
    phase_ref : (1, k*D)   f32  0 for even cols, pi/2 for odd cols, tiled k x
    x_ref     : (tm, k*D)  x-dtype
    o_ref     : (tm, k*D)  x-dtype
    """
    k = pos_ref.shape[1]
    if k == 1:
        # Degenerate contraction: a VPU broadcast-multiply beats the MXU here.
        angle = pos_ref[...] * w_ref[...] + phase_ref[...]
    else:
        angle = jnp.dot(pos_ref[...], w_ref[...],
                        preferred_element_type=jnp.float32,
                        precision=jax.lax.Precision.HIGHEST) + phase_ref[...]
    o_ref[...] = (x_ref[...].astype(jnp.float32) + jnp.sin(angle)).astype(o_ref.dtype)


def _round_up(a, b):
    return -(-a // b) * b


@partial(jax.jit, static_argnames=("tm",))
def _pe_forward(x, pos_packed, w, phase, *, tm):
    N, D = x.shape
    n_pack, k = pos_packed.shape
    kD = k * D
    n_rows_packed = n_pack * k
    if n_rows_packed != N:                       # only the (<k)-row packing pad
        x = jnp.pad(x, ((0, n_rows_packed - N), (0, 0)))
    x_packed = x.reshape(n_pack, kD)             # lane-dense view (free reshape)

    itemsize = x.dtype.itemsize
    block_bytes = tm * kD * itemsize
    const_bytes = (k + 1) * kD * 4 + 2 * tm * k * 4
    footprint = 4 * block_bytes + 2 * const_bytes        # double-buffered x + out
    vmem_limit = int(min(48 << 20, max(32 << 20, 2 * footprint)))

    out_packed = pl.pallas_call(
        pe_add_kernel,
        out_shape=jax.ShapeDtypeStruct((n_pack, kD), x.dtype),
        grid_spec=pl.GridSpec(
            grid=(pl.cdiv(n_pack, tm),),         # partial final block is masked
            in_specs=[
                pl.BlockSpec((tm, k), lambda i: (i, 0)),     # positions (packed)
                pl.BlockSpec((k, kD), lambda i: (0, 0)),     # W        (constant)
                pl.BlockSpec((1, kD), lambda i: (0, 0)),     # phase    (constant)
                pl.BlockSpec((tm, kD), lambda i: (i, 0)),    # x        (packed)
            ],
            out_specs=pl.BlockSpec((tm, kD), lambda i: (i, 0)),
        ),
        compiler_params=pltpu.CompilerParams(
            dimension_semantics=("parallel",),
            vmem_limit_bytes=vmem_limit,
        ),
    )(pos_packed, w, phase, x_packed)

    out = out_packed.reshape(n_rows_packed, D)
    return out if n_rows_packed == N else out[:N]


_CONST_CACHE = {}


def _pe_constants(counts_key, D):
    """Host-side, counts-derived constants; cached across calls."""
    key = (counts_key, D)
    cached = _CONST_CACHE.get(key)
    if cached is not None:
        return cached

    counts_np = np.asarray(counts_key, dtype=np.int64)
    N = int(counts_np.sum())
    seg_starts = np.cumsum(counts_np) - counts_np
    offsets = np.repeat(seg_starts, counts_np)
    pos_rows = (np.arange(N) - offsets).astype(np.float32)   # restarts per segment

    # Lane-packing factor: make the last block dim a multiple of 128.
    k = 128 // math.gcd(D, 128) if D < 128 else 1
    if k > 16:   # pathological d_model: fall back to masked lane stores
        k = 1
    kD = k * D
    n_pack = -(-N // k)
    pos_padded = np.zeros((n_pack * k,), np.float32)
    pos_padded[:N] = pos_rows
    pos_packed = jnp.asarray(pos_padded.reshape(n_pack, k))

    # Column-only constants (computed once).
    d_idx = np.arange(D, dtype=np.float64)
    inv_freq = np.exp(-(d_idx - (d_idx % 2)) * (math.log(10000.0) / D)).astype(np.float32)
    phase_col = np.where((np.arange(D) % 2) == 1, math.pi / 2, 0.0).astype(np.float32)
    w_np = np.zeros((k, kD), np.float32)
    for r in range(k):
        w_np[r, r * D:(r + 1) * D] = inv_freq
    w = jnp.asarray(w_np)                                    # (k, kD)
    phase = jnp.asarray(np.tile(phase_col, k)[None, :])      # (1, kD)

    cached = (pos_packed, w, phase, k)
    _CONST_CACHE[key] = cached
    return cached


def positional_encoding_forward(x, counts, *, target_block_bytes=4 << 20):
    """x: (N, d_model), counts: python list / 1-D ints, sum(counts) == N."""
    N, D = x.shape
    counts_key = tuple(int(c) for c in counts)
    assert sum(counts_key) == N, "sum(counts) must equal x.shape[0]"

    pos_packed, w, phase, k = _pe_constants(counts_key, D)
    n_pack = pos_packed.shape[0]
    kD = k * D
    itemsize = jnp.dtype(x.dtype).itemsize

    # --- row-tile (tm) selection: ~4 MiB blocks, no artificial row cap -------
    cap = max(8, (target_block_bytes // (kD * itemsize)) // 8 * 8)
    if n_pack <= cap:
        tm = n_pack                           # single full block (always legal)
        # v7x megacore: give both TensorCores a block when there is enough data
        if n_pack >= 16 and n_pack * kD * itemsize > (1 << 20):
            tm = _round_up(-(-n_pack // 2), 8)
    else:
        tm = cap
    if itemsize == 2 and tm != n_pack and tm % 16 != 0:
        tm = _round_up(tm, 16)                # bf16 sublane packing

    return _pe_forward(x, pos_packed, w, phase, tm=tm)


def positional_encoding_reference(x, counts, max_len=5000):
    """Pure NumPy port of the PyTorch module (eval mode) for verification."""
    N, d_model = x.shape
    pe = np.zeros((max_len, d_model), dtype=np.float32)
    position = np.arange(0, max_len, dtype=np.float32)[:, None]
    div_term = np.exp(np.arange(0, d_model, 2, dtype=np.float32)
                      * (-math.log(10000.0) / d_model))
    pe[:, 0::2] = np.sin(position * div_term)
    pe[:, 1::2] = np.cos(position * div_term[: d_model // 2])
    pe_rel = np.concatenate([pe[:c, :] for c in counts], axis=0)
    return np.asarray(x, dtype=np.float32) + pe_rel


if __name__ == "__main__":
    key = jax.random.PRNGKey(0)
    k1, k2, k3 = jax.random.split(key, 3)

    # Case 1: d_model = 32 < 128 -> lane packing (k = 4); N = 17 not a multiple
    # of k, so the small packing pad + final slice path is exercised.
    d_model = 32
    counts = [5, 9, 3]
    N = sum(counts)
    x = jax.random.normal(k1, (N, d_model), dtype=jnp.float32)
    out = jax.block_until_ready(positional_encoding_forward(x, counts))
    ref = positional_encoding_reference(np.asarray(x), counts)
    np.testing.assert_allclose(np.asarray(out), ref, rtol=1e-5, atol=2e-5)

    # Case 2: d_model = 128 (already lane-dense, k = 1, single full block).
    d_model2 = 128
    counts2 = [7, 9, 4, 12]
    N2 = sum(counts2)
    x2 = jax.random.normal(k2, (N2, d_model2), dtype=jnp.float32)
    out2 = jax.block_until_ready(positional_encoding_forward(x2, counts2))
    ref2 = positional_encoding_reference(np.asarray(x2), counts2)
    np.testing.assert_allclose(np.asarray(out2), ref2, rtol=1e-5, atol=2e-5)

    # Case 3: multi-step grid with a masked partial final block (small
    # target_block_bytes forces tm=128 over 300 rows -> grid of 3).
    d_model3 = 128
    counts3 = [48, 57, 33, 60, 52, 50]       # sum = 300
    N3 = sum(counts3)
    x3 = jax.random.normal(k3, (N3, d_model3), dtype=jnp.float32)
    out3 = jax.block_until_ready(
        positional_encoding_forward(x3, counts3, target_block_bytes=64 * 1024))
    ref3 = positional_encoding_reference(np.asarray(x3), counts3)
    np.testing.assert_allclose(np.asarray(out3), ref3, rtol=1e-5, atol=2e-5)

    print("KERNEL_OK")
</pallas_src>

<mosaic_0001>
module attributes {stable_mosaic.version = 11 : i64} {
  func.func @pe_add_kernel(%arg0: i32, %arg1: memref<5x4xf32, #tpu.memory_space<vmem>>, %arg2: memref<4x128xf32, #tpu.memory_space<vmem>>, %arg3: memref<1x128xf32, #tpu.memory_space<vmem>>, %arg4: memref<5x128xf32, #tpu.memory_space<vmem>>, %arg5: memref<5x128xf32, #tpu.memory_space<vmem>>) attributes {dimension_semantics = [#tpu.dimension_semantics<parallel>], iteration_bounds = array<i64: 1>, scalar_prefetch = 0 : i64, scratch_operands = 0 : i64, tpu.core_type = #tpu.core_type<tc>, window_params = [{transform_indices = @transform_0, window_bounds = array<i64: 5, 4>}, {pipeline_mode = #tpu.pipeline_mode<synchronous>, transform_indices = @transform_1, window_bounds = array<i64: 4, 128>}, {pipeline_mode = #tpu.pipeline_mode<synchronous>, transform_indices = @transform_2, window_bounds = array<i64: 1, 128>}, {transform_indices = @transform_3, window_bounds = array<i64: 5, 128>}, {transform_indices = @transform_4, window_bounds = array<i64: 5, 128>}]} {
    %c0 = arith.constant 0 : index
    %c0_0 = arith.constant 0 : index
    %0 = vector.load %arg1[%c0, %c0_0] : memref<5x4xf32, #tpu.memory_space<vmem>>, vector<5x4xf32>
    %c0_1 = arith.constant 0 : index
    %c0_2 = arith.constant 0 : index
    %1 = vector.load %arg2[%c0_1, %c0_2] : memref<4x128xf32, #tpu.memory_space<vmem>>, vector<4x128xf32>
    %cst = arith.constant dense<0.000000e+00> : vector<5x128xf32>
    %2 = tpu.matmul %0, %1, %cst {dimension_numbers = #tpu.dot_dimension_numbers<[1], [0], [0], [1], [0, 0, 1, 1], [], []>, precision = #tpu.contract_precision<fp32>} : vector<5x4xf32>, vector<4x128xf32>, vector<5x128xf32> -> vector<5x128xf32>
    %c0_3 = arith.constant 0 : index
    %c0_4 = arith.constant 0 : index
    %3 = vector.load %arg3[%c0_3, %c0_4] : memref<1x128xf32, #tpu.memory_space<vmem>>, vector<1x128xf32>
    %4 = vector.broadcast %3 : vector<1x128xf32> to vector<5x128xf32>
    %5 = arith.addf %2, %4 : vector<5x128xf32>
    %c0_5 = arith.constant 0 : index
    %c0_6 = arith.constant 0 : index
    %6 = vector.load %arg4[%c0_5, %c0_6] : memref<5x128xf32, #tpu.memory_space<vmem>>, vector<5x128xf32>
    %7 = math.sin %5 : vector<5x128xf32>
    %8 = arith.addf %6, %7 : vector<5x128xf32>
    %c0_7 = arith.constant 0 : index
    %c0_8 = arith.constant 0 : index
    %9 = vector.load %arg5[%c0_7, %c0_8] : memref<5x128xf32, #tpu.memory_space<vmem>>, vector<5x128xf32>
    tpu.vector_store %arg5[%c0_7, %c0_8], %8 {strides = array<i32>} : memref<5x128xf32, #tpu.memory_space<vmem>>, vector<5x128xf32>,
    return
  }
  func.func @transform_0(%arg0: i32) -> (i32, i32) {
    %c0_i32 = arith.constant 0 : i32
    %c0_i32_0 = arith.constant 0 : i32
    return %arg0, %c0_i32 : i32, i32
  }
  func.func @transform_1(%arg0: i32) -> (i32, i32) {
    %c0_i32 = arith.constant 0 : i32
    %c0_i32_0 = arith.constant 0 : i32
    %c0_i32_1 = arith.constant 0 : i32
    return %c0_i32, %c0_i32_0 : i32, i32
  }
  func.func @transform_2(%arg0: i32) -> (i32, i32) {
    %c0_i32 = arith.constant 0 : i32
    %c0_i32_0 = arith.constant 0 : i32
    %c0_i32_1 = arith.constant 0 : i32
    return %c0_i32, %c0_i32_0 : i32, i32
  }
  func.func @transform_3(%arg0: i32) -> (i32, i32) {
    %c0_i32 = arith.constant 0 : i32
    %c0_i32_0 = arith.constant 0 : i32
    return %arg0, %c0_i32 : i32, i32
  }
  func.func @transform_4(%arg0: i32) -> (i32, i32) {
    %c0_i32 = arith.constant 0 : i32
    %c0_i32_0 = arith.constant 0 : i32
    return %arg0, %c0_i32 : i32, i32
  }
}

</mosaic_0001>

<bundles_post_ra>
// kernel: _pe_forward.1
= control target key start
LH: loop header
LB: loop body
LE: loop exit
PB: predicated region body
PF: predicated region fallthrough
CT: control target
= control target key end

     0   :  { %vm30_vm0 = vcmask 1043456   ;;  %vm26_vm1 = vcmask 31744   ;;  %v654_v0 = vmov 0.0   ;;  %vm655_vm2 = vmmov 0   ;;  %s729_s1 = inlined_call_operand.vmem [shape: f32[4,128], index: 1, kind: input, shape index: {}]   ;;  %s730_s0 = inlined_call_operand.vmem [shape: f32[5,4], index: 0, kind: input, shape index: {}]   ;;  %s731_s2 = inlined_call_operand.vmem [shape: f32[1,128], index: 2, kind: input, shape index: {}]   ;;  %s732_s3 = inlined_call_operand.vmem [shape: f32[5,128], index: 3, kind: input, shape index: {}]   ;;  %s733_s4 = inlined_call_operand.vmem [shape: f32[5,128], index: 4, kind: output, shape index: {}]  }
   0x1   :  { %608 = vmatprep.subr.mxu0 %v654_v0  ;;  %v18_v1 = vld [vmem:[%s729_s1] sm:$0xf]  ;;  %610 = vmatprep.mubr.msk.f32.mxu0 %vm655_vm2, %v654_v0  ;;  %v656_v44 = vmov 683565275   ;;  %v657_v46 = vmov 2475754826  }
   0x2   :  { %v17_v2 = vld [vmem:[%s730_s0] sm:$0x1f]  ;;  %v32_v3 = vsel %vm30_vm0, %v18_v1, 0  ;;  %613 = vmatprep.subr.mxu1 %v654_v0  ;;  %615 = vmatprep.mubr.msk.f32.mxu1 %vm655_vm2, %v654_v0  ;;  %v658_v49 = vmov 2131351028  }
   0x3   :  { %v28_v4 = vsel %vm26_vm1, %v17_v2, 0  ;;  %v65_v5 = vand.u32 4294901760, %v32_v3  ;;  %v591_v15 = vld [vmem:[%s731_s2] ss:$0 sm:$0xff]  ;;  %v659_v52 = vmov 2102212464  }
   0x4   :  { %v100_v6 = vand.u32 4294901760, %v28_v4  ;;  %v660_v55 = vmov 920167782   ;;  %v661_v58 = vmov 1326507024  }
   0x5   :  { %609 = vmatpush3.msra.mxu0 %v65_v5  ;;  %v142_v8 = vsub.f32 %v32_v3, %v65_v5 }
   0x6   :  { %v101_v7 = vsub.f32 %v28_v4, %v100_v6  ;;  %618 = vmatprep.subr.mxu0 %v654_v0 }
   0x7   :  { %v143_v10 = vand.u32 4294901760, %v142_v8 }
   0x8   :  { %v102_v9 = vand.u32 4294901760, %v101_v7 }
   0x9   :  { %v144_v12 = vsub.f32 %v142_v8, %v143_v10 }
   0xa   :  { %v103_v11 = vsub.f32 %v101_v7, %v102_v9 }
   0xb   :  { %v145_v14 = vand.u32 4294901760, %v144_v12 }
   0xc   :  { %v104_v13 = vand.u32 4294901760, %v103_v11 }
   0xd   :  { %614 = vmatpush3.msra.mxu1 %v145_v14 }
   0xe   :  { %611 = vmatmul.mubr.f32.vlgmr.msra.gmra.mxu0 %v104_v13  ;;  %616 = vmatmul.mubr.f32.vlgmr.msra.gmra.mxu1 %v100_v6 }
   0xf   :  { %619 = vmatpush3.msra.mxu0 %v142_v8  ;;  %623 = vmatprep.subr.mxu1 %v654_v0 }
  0x10   :  { %620 = vmatprep.mubr.msk.f32.mxu0 %vm655_vm2, %v654_v0  ;;  %624 = vmatpush3.msra.mxu1 %v65_v5 }
  0x11   :  { %628 = vmatprep.subr.mxu0 %v654_v0  ;;  %625 = vmatprep.mubr.msk.f32.mxu1 %vm655_vm2, %v654_v0 }
  0x12   :  { %621 = vmatmul.mubr.f32.vlgmr.msra.gmra.mxu0 %v101_v7  ;;  %626 = vmatmul.mubr.f32.vlgmr.msra.gmra.mxu1 %v102_v9 }
  0x13   :  { %629 = vmatpush3.msra.mxu0 %v143_v10  ;;  %633 = vmatprep.subr.mxu1 %v654_v0 }
  0x14   :  { %630 = vmatprep.mubr.msk.f32.mxu0 %vm655_vm2, %v654_v0  ;;  %634 = vmatpush3.msra.mxu1 %v65_v5 }
  0x15   :  { %635 = vmatprep.mubr.msk.f32.mxu1 %vm655_vm2, %v654_v0 }
  0x16   :  { %631 = vmatmul.mubr.f32.vlgmr.msra.gmra.mxu0 %v100_v6  ;;  %636 = vmatmul.mubr.f32.vlgmr.msra.gmra.mxu1 %v100_v6 }
  0xce   :  { %v106_v16 = vpop.f32.mrf.mxu0  ;;  %v182_v18 = vpop.f32.mrf.mxu1 }
  0xcf   :  { %v107_v17 = vadd.f32 %v591_v15, %v106_v16 }
  0xd0   :  { %v612_v19 = vpop.f32.mrf.mxu0  ;;  %v617_v21 = vpop.f32.mrf.mxu1 }
  0xd1   :  { %v183_v20 = vadd.f32 %v182_v18, %v107_v17 }
  0xd2   :  { %v256_v22 = vpop.f32.mrf.mxu0  ;;  %v330_v24 = vpop.f32.mrf.mxu1 }
  0xd3   :  { %v257_v23 = vadd.f32 %v256_v22, %v183_v20 }
  0xd4   :  { %v622_v25 = vpop.f32.mrf.mxu0  ;;  %v627_v27 = vpop.f32.mrf.mxu1 }
  0xd5   :  { %v331_v26 = vadd.f32 %v330_v24, %v257_v23 }
  0xd6   :  { %v404_v28 = vpop.f32.mrf.mxu0  ;;  %v476_v30 = vpop.f32.mrf.mxu1 }
  0xd7   :  { %v405_v29 = vadd.f32 %v404_v28, %v331_v26 }
  0xd8   :  { %v632_v31 = vpop.f32.mrf.mxu0  ;;  %v637_v33 = vpop.f32.mrf.mxu1 }
  0xd9   :  { %v702_v32 = vadd.f32 %v476_v30, %v405_v29 }
  0xdb   :  { %v484_v34 = vand.u32 2139095040, %v702_v32  ;;  %v481_v38 = vand.u32 2147483647, %v702_v32  ;;  %vm483_vm10 = vcmp.lt.s32.totalorder %v702_v32, 0  ;;  %vm573_vm15 = vweird.f32 %v702_v32 }
  0xdd   :  { %v485_v35 = vshrl.u32 %v484_v34, 23  ;;  %v488_v41 = vand.u32 8388607, %v481_v38  ;;  %vm482_vm11 = vcmp.le.f32.partialorder %v481_v38, 0.7853982 }
  0xde   :  { %v480_v38 = vld [vmem:[%s732_s3] sm:$0x1f] }
  0xdf   :  { %v592_v36 = vadd.s32 4294967169, %v485_v35  ;;  %v489_v60 = vor.u32 8388608, %v488_v41 }
  0xe1   :  { %v491_v37 = vadd.s32 1, %v592_v36  ;;  %v529_v10 = vshll.u32 %v489_v60, 8 }
  0xe3   :  { %vm492_vm3 = vcmp.gt.s32.totalorder %v491_v37, 0 }
  0xe4   :  { %v493_v39 = vsel %vm492_vm3, %v491_v37, 0 }
  0xe5   :  { %v495_v40 = vand.u32 31, %v493_v39  ;;  %v494_v43 = vshrl.u32 %v493_v39, 5 }
  0xe7   :  { %v496_v42 = vsub.s32 32, %v495_v40  ;;  %v498_v45 = vshll.u32 %v656_v44, %v495_v40  ;;  %v501_v47 = vshll.u32 %v657_v46, %v495_v40  ;;  %v504_v51 = vshll.u32 %v658_v49, %v495_v40 }
  0xe8   :  { %v507_v54 = vshll.u32 %v659_v52, %v495_v40  ;;  %v510_v57 = vshll.u32 %v660_v55, %v495_v40  ;;  %vm513_vm4 = vcmp.lt.s32.totalorder %v494_v43, 1  ;;  %vm516_vm5 = vcmp.lt.s32.totalorder %v494_v43, 4 }
  0xe9   :  { %v499_v48 = vshrl.u32 %v657_v46, %v496_v42  ;;  %v502_v50 = vshrl.u32 %v658_v49, %v496_v42  ;;  %v505_v53 = vshrl.u32 %v659_v52, %v496_v42  ;;  %v508_v56 = vshrl.u32 %v660_v55, %v496_v42 }
  0xea   :  { %v511_v59 = vshrl.u32 %v661_v58, %v496_v42  ;;  %v497_v5 = vshrl.u32 %v656_v44, %v496_v42  ;;  %vm515_vm6 = vcmp.lt.s32.totalorder %v494_v43, 3  ;;  %vm514_vm7 = vcmp.lt.s32.totalorder %v494_v43, 2 }
  0xeb   :  { %v500_v61 = vor.u32 %v499_v48, %v498_v45  ;;  %v503_v62 = vor.u32 %v502_v50, %v501_v47  ;;  %v506_v63 = vor.u32 %v505_v53, %v504_v51  ;;  %v509_v0 = vor.u32 %v508_v56, %v507_v54 }
  0xec   :  { %v512_v1 = vor.u32 %v511_v59, %v510_v57 }
  0xed   :  { %v518_v2 = vsel %vm516_vm5, %v506_v63, 2102212464  ;;  %v521_v3 = vsel %vm513_vm4, %v500_v61, %v503_v62  ;;  %v525_v4 = vsel %vm513_vm4, %v503_v62, %v506_v63  ;;  %v522_v6 = vsel %vm516_vm5, %v509_v0, 920167782 }
  0xee   :  { %v526_v7 = vsel %vm516_vm5, %v512_v1, 1326507024  ;;  %v523_v8 = vsel %vm515_vm6, %v506_v63, %v522_v6  ;;  %v517_v11 = vsel %vm513_vm4, %v497_v5, %v500_v61  ;;  %v519_v12 = vsel %vm515_vm6, %v503_v62, %v518_v2 }
  0xef   :  { %v527_v9 = vsel %vm515_vm6, %v509_v0, %v526_v7  ;;  %v524_v13 = vsel %vm514_vm7, %v521_v3, %v523_v8  ;;  %v520_v19 = vsel %vm514_vm7, %v517_v11, %v519_v12 }
  0xf0   :  { %v528_v14 = vsel %vm514_vm7, %v525_v4, %v527_v9  ;;  %v711_v17 = vmul.u32.u64.low %v529_v10, %v524_v13  ;;  %v712_v18 = vmul.u32.u64.high %v529_v10, %v524_v13, %v711_v17  ;;  %v536_v21 = vmul.u32 %v529_v10, %v520_v19 }
  0xf1   :  { %v708_v15 = vmul.u32.u64.low %v529_v10, %v528_v14  ;;  %v709_v16 = vmul.u32.u64.high %v529_v10, %v528_v14, %v708_v15 }
  0xf2   :  { %v539_v20 = vadd.s32 1, %v712_v18 }
  0xf3   :  { %vm538_vm8 = vc.u32 %v709_v16, %v711_v17  ;;  %v537_v34 = vadd.s32 %v711_v17, %v709_v16 }
  0xf4   :  { %v540_v22 = vsel %vm538_vm8, %v539_v20, %v712_v18 }
  0xf5   :  { %v541_v23 = vadd.s32 %v540_v22, %v536_v21 }
  0xf7   :  { %v542_v24 = vadd.s32 536870912, %v541_v23 }
  0xf9   :  { %v543_v25 = vshrl.u32 %v542_v24, 30 }
  0xfb   :  { %v544_v26 = vshll.u32 %v543_v25, 30  ;;  %v567_v48 = vsub.s32 4, %v543_v25 }
  0xfd   :  { %v545_v27 = vsub.s32 %v541_v23, %v544_v26  ;;  %v568_v51 = vsel %vm483_vm10, %v567_v48, %v543_v25 }
  0xfe   :  { %v570_v52 = vsel %vm482_vm11, 0, %v568_v51 }
  0xff   :  { %v547_v28 = vsub.s32 0, %v545_v27  ;;  %v574_v53 = vadd.s32 3, %v570_v52 }
 0x101   :  { %v593_v29 = vmin.u32 %v547_v28, %v545_v27  ;;  %v575_v54 = vand.u32 3, %v574_v53 }
 0x103   :  { %v549_v30 = vclz %v593_v29  ;;  %vm580_vm12 = vcmp.eq.s32.totalorder %v575_v54, 2  ;;  %vm577_vm13 = vcmp.eq.s32.totalorder %v575_v54, 0  ;;  %vm576_vm14 = vcmp.lt.s32.totalorder %v575_v54, 2 }
 0x105   :  { %v594_v31 = vadd.s32 4294967294, %v549_v30 }
 0x107   :  { %vm595_vm9 = vcmp.lt.s32.totalorder %v594_v31, 0 }
 0x108   :  { %v552_v33 = vsel %vm595_vm9, 0, %v594_v31 }
 0x109   :  { %v553_v35 = vsub.s32 32, %v552_v33  ;;  %v557_v36 = vsub.s32 4294967266, %v552_v33  ;;  %v554_v37 = vshll.u32 %v545_v27, %v552_v33 }
 0x10b   :  { %v555_v39 = vshrl.u32 %v537_v34, %v553_v35  ;;  %v558_v40 = vadd.s32 127, %v557_v36 }
 0x10d   :  { %v556_v41 = vor.u32 %v555_v39, %v554_v37  ;;  %v559_v42 = vshll.u32 %v558_v40, 23 }
 0x10f   :  { %v560_v43 = vor.u32 4788187, %v559_v42  ;;  %v563_v45 = vcvt.s32.f32 %v556_v41 }
 0x111   :  { %v561_v44 = vand.u32 2147483647, %v560_v43 }
 0x113   :  { %v564_v46 = vmul.f32 %v563_v45, %v561_v44 }
 0x115   :  { %v565_v47 = vxor.u32 2147483648, %v564_v46 }
 0x117   :  { %v566_v49 = vsel %vm483_vm10, %v565_v47, %v564_v46 }
 0x118   :  { %v569_v50 = vsel %vm482_vm11, %v702_v32, %v566_v49 }
 0x119   :  { %650 = vcosq.f32 %v569_v50 }
 0x11a   :  { %652 = vsinq.f32 %v569_v50 }
 0x126   :  { %v651_v55 = vpop.eup %650 }
 0x127   :  { %v653_v56 = vpop.eup %652  ;;  %v581_v57 = vxor.u32 2147483648, %v651_v55 }
 0x128   :  { %v578_v58 = vxor.u32 2147483648, %v653_v56 }
 0x129   :  { %v582_v59 = vsel %vm580_vm12, %v581_v57, %v653_v56 }
 0x12a   :  { %v579_v60 = vsel %vm577_vm13, %v651_v55, %v578_v58 }
 0x12b   :  { %v583_v61 = vsel %vm576_vm14, %v579_v60, %v582_v59 }
 0x12c   :  { %v584_v62 = vsel %vm573_vm15, nan, %v583_v61 }
 0x12d   :  { %v585_v63 = vadd.f32 %v584_v62, %v480_v38 }
 0x12f   :  { %586 = vst [vmem:[%s733_s4] sm:$0x1f] %v585_v63 }

</bundles_post_ra>
